<compile_context>
chip_gen: v7x
topology: tpu7x:2x2x1
jax: 0.10.0
libtpu: 0.0.40
codegen_flags: <defaults>
</compile_context>

<pallas_src>
import jax
import jax.numpy as jnp
from jax.experimental import pallas as pl
from jax.experimental.pallas import tpu as pltpu

RESIDUAL_KERNELS = 32   # stand-in for config.RESIDUAL_KERNELS
BOARD_SIZE = 8          # board_size
BN_EPS = 1e-5

# ~4 MiB per x block at C=32, S=64, f32: large enough to amortize the ~0.35 us
# per-grid-step overhead, small enough (x2 double-buffering + temporaries) to
# fit scoped VMEM on v5e / v6e / v7x.
MAX_BATCH_TILE = 512


def value_head_kernel(x_ref,        # VMEM (TB, C, S)       input tile (native layout)
                      wc_ref,       # VMEM (C, 1)     f32   conv weight * BN scale (folded)
                      bnb_ref,      # VMEM (1, 1)     f32   folded BN bias
                      w1_ref,       # VMEM (S, R)     f32   Linear1 weight (pre-transposed)
                      b1_ref,       # VMEM (1, R)     f32
                      w2_ref,       # VMEM (R, 1)     f32   Linear2 weight (pre-transposed)
                      b2_ref,       # VMEM (1, 1)     f32
                      o_ref):       # VMEM (TB, 1)    f32
    x = x_ref[...].astype(jnp.float32)                       # (TB, C, S)
    wc = wc_ref[...]                                          # (C, 1), C on sublanes

    # 1x1 conv (C -> 1, no bias) with BN scale folded in: contract the channel
    # (sublane) axis, then add the folded BN bias and apply ReLU.
    y = jnp.sum(x * wc[None, :, :], axis=1) + bnb_ref[...]    # (TB, S)
    y = jnp.maximum(y, 0.0)

    # Linear(S -> R) + ReLU   (MXU, f32 accumulation)
    z = jnp.dot(y, w1_ref[...], preferred_element_type=jnp.float32) + b1_ref[...]
    z = jnp.maximum(z, 0.0)                                   # (TB, R)

    # Linear(R -> 1) + Tanh   (MXU + EUP)
    out = jnp.dot(z, w2_ref[...], preferred_element_type=jnp.float32) + b2_ref[...]
    # TODO(synk): output last dim is 1 (masked vst); output bytes are ~1/2000
    #             of input bytes here, so the lane-dense (1, TB) layout (plus
    #             an in-kernel transpose) was intentionally skipped.
    o_ref[...] = jnp.tanh(out).astype(o_ref.dtype)            # (TB, 1)


def value_head(x_nchw, params):
    """x_nchw: (B, C, H, W) f32 or bf16  ->  (B, 1) f32."""
    B, C, H, W = x_nchw.shape
    S = H * W
    R = params["w1"].shape[1]

    # Native layout: (B, C, H, W) -> (B, C, S).  Pure reshape of contiguous
    # dims: no transpose, no extra HBM copy of the dominant tensor.
    x = x_nchw.reshape(B, C, S)

    # Fold eval-mode BatchNorm2d(1) into the conv weight + a scalar bias.
    scale = params["bn_gamma"] * jax.lax.rsqrt(params["bn_var"] + BN_EPS)
    wc = (params["conv_w"].reshape(C, 1) * scale).astype(jnp.float32)          # (C, 1)
    bn_bias = jnp.reshape(params["bn_beta"] - params["bn_mean"] * scale,
                          (1, 1)).astype(jnp.float32)                          # (1, 1)

    TB = B if B <= MAX_BATCH_TILE else MAX_BATCH_TILE
    grid = (pl.cdiv(B, TB),)

    return pl.pallas_call(
        value_head_kernel,
        out_shape=jax.ShapeDtypeStruct((B, 1), jnp.float32),
        grid=grid,
        in_specs=[
            # x: batch-tiled, streamed + double-buffered by the Pallas pipeline.
            pl.BlockSpec((TB, C, S), lambda i: (i, 0, 0)),
            # Weights / small constants: constant block index -> fetched once,
            # VMEM-resident across all grid steps.
            pl.BlockSpec((C, 1), lambda i: (0, 0)),
            pl.BlockSpec((1, 1), lambda i: (0, 0)),
            pl.BlockSpec((S, R), lambda i: (0, 0)),
            pl.BlockSpec((1, R), lambda i: (0, 0)),
            pl.BlockSpec((R, 1), lambda i: (0, 0)),
            pl.BlockSpec((1, 1), lambda i: (0, 0)),
        ],
        out_specs=pl.BlockSpec((TB, 1), lambda i: (i, 0)),
        compiler_params=pltpu.CompilerParams(
            # Batch rows are independent: shard grid steps across TensorCores
            # (~2x on v7x megacore); harmless on single-TC chips.
            dimension_semantics=("parallel",),
            vmem_limit_bytes=32 * 1024 * 1024,
        ),
    )(x, wc, bn_bias, params["w1"], params["b1"], params["w2"], params["b2"])


def init_params(key, channels, board_size, res_kernels):
    S = board_size * board_size
    k = jax.random.split(key, 5)
    return {
        # Conv2d(C -> 1, kernel_size=1, bias=False): weight (1, C, 1, 1) -> (1, C)
        "conv_w": (jax.random.normal(k[0], (1, channels), jnp.float32) * 0.1),
        # BatchNorm2d(1): deterministic, nontrivial running stats / affine
        "bn_gamma": jnp.float32(1.2),
        "bn_beta": jnp.float32(0.1),
        "bn_mean": jnp.float32(0.05),
        "bn_var": jnp.float32(0.9),
        # Linear(S -> R): PyTorch weight is (R, S); store transposed as (S, R)
        "w1": (jax.random.normal(k[1], (S, res_kernels), jnp.float32) * 0.05),
        "b1": (jax.random.normal(k[2], (1, res_kernels), jnp.float32) * 0.01),
        # Linear(R -> 1): store as (R, 1)
        "w2": (jax.random.normal(k[3], (res_kernels, 1), jnp.float32) * 0.05),
        "b2": (jax.random.normal(k[4], (1, 1), jnp.float32) * 0.01),
    }


if __name__ == "__main__":
    key = jax.random.PRNGKey(0)
    k_x, k_p = jax.random.split(key)

    B, C, H, W = 2, RESIDUAL_KERNELS, BOARD_SIZE, BOARD_SIZE
    x = jax.random.normal(k_x, (B, C, H, W), jnp.float32)
    params = init_params(k_p, C, BOARD_SIZE, RESIDUAL_KERNELS)

    out = value_head(x, params)
    out = jax.block_until_ready(out)
    assert out.shape == (B, 1), out.shape
    print("KERNEL_OK")
</pallas_src>

<mosaic_0001>
module attributes {stable_mosaic.version = 11 : i64} {
  func.func @value_head_kernel(%arg0: i32, %arg1: memref<2x32x64xf32, #tpu.memory_space<vmem>>, %arg2: memref<32x1xf32, #tpu.memory_space<vmem>>, %arg3: memref<1x1xf32, #tpu.memory_space<vmem>>, %arg4: memref<64x32xf32, #tpu.memory_space<vmem>>, %arg5: memref<1x32xf32, #tpu.memory_space<vmem>>, %arg6: memref<32x1xf32, #tpu.memory_space<vmem>>, %arg7: memref<1x1xf32, #tpu.memory_space<vmem>>, %arg8: memref<2x1xf32, #tpu.memory_space<vmem>>) attributes {dimension_semantics = [#tpu.dimension_semantics<parallel>], iteration_bounds = array<i64: 1>, scalar_prefetch = 0 : i64, scratch_operands = 0 : i64, tpu.core_type = #tpu.core_type<tc>, window_params = [{transform_indices = @transform_0, window_bounds = array<i64: 2, 32, 64>}, {pipeline_mode = #tpu.pipeline_mode<synchronous>, transform_indices = @transform_1, window_bounds = array<i64: 32, 1>}, {pipeline_mode = #tpu.pipeline_mode<synchronous>, transform_indices = @transform_2, window_bounds = array<i64: 1, 1>}, {pipeline_mode = #tpu.pipeline_mode<synchronous>, transform_indices = @transform_3, window_bounds = array<i64: 64, 32>}, {pipeline_mode = #tpu.pipeline_mode<synchronous>, transform_indices = @transform_4, window_bounds = array<i64: 1, 32>}, {pipeline_mode = #tpu.pipeline_mode<synchronous>, transform_indices = @transform_5, window_bounds = array<i64: 32, 1>}, {pipeline_mode = #tpu.pipeline_mode<synchronous>, transform_indices = @transform_6, window_bounds = array<i64: 1, 1>}, {transform_indices = @transform_7, window_bounds = array<i64: 2, 1>}]} {
    %c0 = arith.constant 0 : index
    %c0_0 = arith.constant 0 : index
    %c0_1 = arith.constant 0 : index
    %0 = vector.load %arg1[%c0, %c0_0, %c0_1] : memref<2x32x64xf32, #tpu.memory_space<vmem>>, vector<2x32x64xf32>
    %c0_2 = arith.constant 0 : index
    %c0_3 = arith.constant 0 : index
    %1 = vector.load %arg2[%c0_2, %c0_3] : memref<32x1xf32, #tpu.memory_space<vmem>>, vector<32x1xf32>
    %2 = vector.shape_cast %1 : vector<32x1xf32> to vector<1x32x1xf32>
    %3 = vector.broadcast %2 : vector<1x32x1xf32> to vector<2x32x64xf32>
    %4 = arith.mulf %0, %3 : vector<2x32x64xf32>
    %cst = arith.constant dense<0.000000e+00> : vector<2x64xf32>
    %5 = vector.multi_reduction <add>, %4, %cst [1] : vector<2x32x64xf32> to vector<2x64xf32>
    %c0_4 = arith.constant 0 : index
    %c0_5 = arith.constant 0 : index
    %6 = vector.load %arg3[%c0_4, %c0_5] : memref<1x1xf32, #tpu.memory_space<vmem>>, vector<1x1xf32>
    %7 = vector.broadcast %6 : vector<1x1xf32> to vector<2x64xf32>
    %8 = arith.addf %5, %7 : vector<2x64xf32>
    %cst_6 = arith.constant 0.000000e+00 : f32
    %9 = vector.broadcast %cst_6 : f32 to vector<2x64xf32>
    %10 = arith.maximumf %8, %9 : vector<2x64xf32>
    %c0_7 = arith.constant 0 : index
    %c0_8 = arith.constant 0 : index
    %11 = vector.load %arg4[%c0_7, %c0_8] : memref<64x32xf32, #tpu.memory_space<vmem>>, vector<64x32xf32>
    %cst_9 = arith.constant dense<0.000000e+00> : vector<2x32xf32>
    %12 = tpu.matmul %10, %11, %cst_9 {dimension_numbers = #tpu.dot_dimension_numbers<[1], [0], [0], [1], [0, 0, 1, 1], [], []>} : vector<2x64xf32>, vector<64x32xf32>, vector<2x32xf32> -> vector<2x32xf32>
    %c0_10 = arith.constant 0 : index
    %c0_11 = arith.constant 0 : index
    %13 = vector.load %arg5[%c0_10, %c0_11] : memref<1x32xf32, #tpu.memory_space<vmem>>, vector<1x32xf32>
    %14 = vector.broadcast %13 : vector<1x32xf32> to vector<2x32xf32>
    %15 = arith.addf %12, %14 : vector<2x32xf32>
    %cst_12 = arith.constant 0.000000e+00 : f32
    %16 = vector.broadcast %cst_12 : f32 to vector<2x32xf32>
    %17 = arith.maximumf %15, %16 : vector<2x32xf32>
    %c0_13 = arith.constant 0 : index
    %c0_14 = arith.constant 0 : index
    %18 = vector.load %arg6[%c0_13, %c0_14] : memref<32x1xf32, #tpu.memory_space<vmem>>, vector<32x1xf32>
    %cst_15 = arith.constant dense<0.000000e+00> : vector<2x1xf32>
    %19 = tpu.matmul %17, %18, %cst_15 {dimension_numbers = #tpu.dot_dimension_numbers<[1], [0], [0], [1], [0, 0, 1, 1], [], []>} : vector<2x32xf32>, vector<32x1xf32>, vector<2x1xf32> -> vector<2x1xf32>
    %c0_16 = arith.constant 0 : index
    %c0_17 = arith.constant 0 : index
    %20 = vector.load %arg7[%c0_16, %c0_17] : memref<1x1xf32, #tpu.memory_space<vmem>>, vector<1x1xf32>
    %21 = vector.broadcast %20 : vector<1x1xf32> to vector<2x1xf32>
    %22 = arith.addf %19, %21 : vector<2x1xf32>
    %23 = math.tanh %22 : vector<2x1xf32>
    %c0_18 = arith.constant 0 : index
    %c0_19 = arith.constant 0 : index
    %24 = vector.load %arg8[%c0_18, %c0_19] : memref<2x1xf32, #tpu.memory_space<vmem>>, vector<2x1xf32>
    tpu.vector_store %arg8[%c0_18, %c0_19], %23 {strides = array<i32>} : memref<2x1xf32, #tpu.memory_space<vmem>>, vector<2x1xf32>,
    return
  }
  func.func @transform_0(%arg0: i32) -> (i32, i32, i32) {
    %c0_i32 = arith.constant 0 : i32
    %c0_i32_0 = arith.constant 0 : i32
    %c0_i32_1 = arith.constant 0 : i32
    return %arg0, %c0_i32, %c0_i32_0 : i32, i32, i32
  }
  func.func @transform_1(%arg0: i32) -> (i32, i32) {
    %c0_i32 = arith.constant 0 : i32
    %c0_i32_0 = arith.constant 0 : i32
    %c0_i32_1 = arith.constant 0 : i32
    return %c0_i32, %c0_i32_0 : i32, i32
  }
  func.func @transform_2(%arg0: i32) -> (i32, i32) {
    %c0_i32 = arith.constant 0 : i32
    %c0_i32_0 = arith.constant 0 : i32
    %c0_i32_1 = arith.constant 0 : i32
    return %c0_i32, %c0_i32_0 : i32, i32
  }
  func.func @transform_3(%arg0: i32) -> (i32, i32) {
    %c0_i32 = arith.constant 0 : i32
    %c0_i32_0 = arith.constant 0 : i32
    %c0_i32_1 = arith.constant 0 : i32
    return %c0_i32, %c0_i32_0 : i32, i32
  }
  func.func @transform_4(%arg0: i32) -> (i32, i32) {
    %c0_i32 = arith.constant 0 : i32
    %c0_i32_0 = arith.constant 0 : i32
    %c0_i32_1 = arith.constant 0 : i32
    return %c0_i32, %c0_i32_0 : i32, i32
  }
  func.func @transform_5(%arg0: i32) -> (i32, i32) {
    %c0_i32 = arith.constant 0 : i32
    %c0_i32_0 = arith.constant 0 : i32
    %c0_i32_1 = arith.constant 0 : i32
    return %c0_i32, %c0_i32_0 : i32, i32
  }
  func.func @transform_6(%arg0: i32) -> (i32, i32) {
    %c0_i32 = arith.constant 0 : i32
    %c0_i32_0 = arith.constant 0 : i32
    %c0_i32_1 = arith.constant 0 : i32
    return %c0_i32, %c0_i32_0 : i32, i32
  }
  func.func @transform_7(%arg0: i32) -> (i32, i32) {
    %c0_i32 = arith.constant 0 : i32
    %c0_i32_0 = arith.constant 0 : i32
    return %arg0, %c0_i32 : i32, i32
  }
}

</mosaic_0001>

<bundles_post_ra>
// kernel: tpu_custom_call.1
= control target key start
LH: loop header
LB: loop body
LE: loop exit
PB: predicated region body
PF: predicated region fallthrough
CT: control target
= control target key end

     0   :  { %v370_v0 = vmov 0   ;;  %v371_v10 = vmov 0.0|0.0   ;;  %vm372_vm0 = vmmov 0   ;;  %v373_v20 = vmov 0.0   ;;  %s507_s1 = inlined_call_operand.vmem [shape: f32[32,1], index: 1, kind: input, shape index: {}]   ;;  %s508_s2 = inlined_call_operand.<no memory space> [shape: f32[1,1], index: 2, kind: input, shape index: {}]   ;;  %s509_s3 = inlined_call_operand.vmem [shape: f32[64,32], index: 3, kind: input, shape index: {}]   ;;  %s510_s5 = inlined_call_operand.vmem [shape: f32[32,1], index: 5, kind: input, shape index: {}]   ;;  %s511_s0 = inlined_call_operand.vmem [shape: f32[2,32,64], index: 0, kind: input, shape index: {}]   ;;  %s512_s6 = inlined_call_operand.<no memory space> [shape: f32[1,1], index: 6, kind: input, shape index: {}]   ;;  %s513_s4 = inlined_call_operand.vmem [shape: f32[1,32], index: 4, kind: input, shape index: {}]   ;;  %s514_s7 = inlined_call_operand.vmem [shape: f32[2,1], index: 7, kind: output, shape index: {}]  }
   0x1   :  { %367 = vset.pattern.permute.xlu1 %v370_v0  ;;  %366 = vset.pattern.permute.xlu0 %v370_v0  ;;  %v40_v1 = vld [vmem:[%s507_s1 + $0x10] sm:$0xff]  ;;  %v38_v2 = vld [vmem:[%s507_s1] sm:$0xff]  ;;  %v12_v3 = vstv %s508_s2  ;;  %v41_v4 = vld [vmem:[%s507_s1 + $0x18] sm:$0xff]  ;;  %vm70_vm1 = vcmask 523264   ;;  %vm128_vm2 = vcmask 1041409   ;;  %vm214_vm3 = vcmask 261120  }
   0x2   :  { %54 = vperm.xlu1 %367, %v40_v1   ;;  %44 = vperm.xlu0 %366, %v38_v2   ;;  %13 = vst [vmem:[#allocation2] sm:$0x1] %v12_v3  ;;  %v39_v5 = vld [vmem:[%s507_s1 + $0x8] sm:$0xff]  ;;  %v111_v7 = vld [vmem:[%s509_s3] sm:$0xff]  ;;  %v113_v11 = vld [vmem:[%s509_s3 + $0x10] sm:$0xff]  ;;  %vm289_vm4 = vcmask 1024  }
   0x3   :  { %v112_v8 = vld [vmem:[%s509_s3 + $0x8] sm:$0xff]  ;;  %344 = vmatprep.subr.bf16.mxu0 %v371_v10  ;;  %356 = vmatprep.subr.bf16.mxu1 %v371_v10  ;;  %v114_v12 = vld [vmem:[%s509_s3 + $0x18] sm:$0xff]  ;;  %v115_v14 = vld [vmem:[%s509_s3 + $0x20] sm:$0xff] }
   0x4   :  { %v345_v9 = vpack.c.bf16 %v112_v8, %v111_v7  ;;  %v348_v13 = vpack.c.bf16 %v114_v12, %v113_v11  ;;  %v116_v15 = vld [vmem:[%s509_s3 + $0x28] sm:$0xff]  ;;  %v117_v17 = vld [vmem:[%s509_s3 + $0x30] sm:$0xff]  ;;  %v118_v18 = vld [vmem:[%s509_s3 + $0x38] sm:$0xff]  ;;  %330 = vmatprep.mubr.msk.f32.mxu0 %vm372_vm0, %v373_v20  ;;  %341 = vmatprep.mubr.msk.f32.mxu1 %vm372_vm0, %v373_v20 }
   0x5   :  { %v351_v16 = vpack.c.bf16 %v116_v15, %v115_v14  ;;  %v354_v19 = vpack.c.bf16 %v118_v18, %v117_v17  ;;  %v203_v21 = vld [vmem:[%s510_s5] sm:$0xff]  ;;  %v204_v22 = vld [vmem:[%s510_s5 + $0x8] sm:$0xff]  ;;  %v32_v28 = vld [vmem:[%s511_s0 + $0x10] sm:$0xff]  ;;  %v14_v15 = vstv %s512_s6 }
   0x6   :  { %59 = vperm.xlu1 %367, %v41_v4   ;;  %49 = vperm.xlu0 %366, %v39_v5   ;;  %v357_v23 = vpack.c.bf16 %v204_v22, %v203_v21  ;;  %v30_v24 = vld [vmem:[%s511_s0] sm:$0xff]  ;;  %v36_v29 = vld [vmem:[%s511_s0 + $0x30] sm:$0xff]  ;;  %v31_v32 = vld [vmem:[%s511_s0 + $0x8] sm:$0xff]  ;;  %15 = vst [vmem:[#allocation3] sm:$0x1] %v14_v15 }
   0x7   :  { %346 = vmatpush3.bf16.msra.mxu0 %v345_v9  ;;  %v34_v25 = vld [vmem:[%s511_s0 + $0x20] sm:$0xff]  ;;  %v35_v33 = vld [vmem:[%s511_s0 + $0x28] sm:$0xff]  ;;  %v33_v35 = vld [vmem:[%s511_s0 + $0x18] sm:$0xff] }
   0x8   :  { %347 = vmatprep.subr.bf16.mxu0 %v371_v10  ;;  %358 = vmatpush3.bf16.msra.mxu1 %v357_v23  ;;  %v37_v36 = vld [vmem:[%s511_s0 + $0x38] sm:$0xff]  ;;  %v205_v12 = vld [vmem:[%s510_s5 + $0x10] sm:$0xff] }
   0x9   :  { %v295_v6 = vld [vmem:[#allocation2] ss:$0 sm:$0xff]  ;;  %359 = vmatprep.subr.bf16.mxu1 %v371_v10 }
   0xa   :  { %104 = vperm.xlu0 %366, %v295_v6  }
   0xb   :  { %349 = vmatpush3.bf16.msra.mxu0 %v348_v13  ;;  %v206_v13 = vld [vmem:[%s510_s5 + $0x18] sm:$0xff] }
   0xc   :  { %350 = vmatprep.subr.bf16.mxu0 %v371_v10  ;;  %v360_v14 = vpack.c.bf16 %v206_v13, %v205_v12 }
   0xd   :  { %v298_v21 = vld [vmem:[#allocation3] ss:$0 sm:$0xff] }
   0xe   :  { %361 = vmatpush3.bf16.msra.mxu1 %v360_v14 }
   0xf   :  { %352 = vmatpush3.bf16.msra.mxu0 %v351_v16  ;;  %v296_v16 = vld [vmem:[%s513_s4] ss:$0 sm:$0xff] }
  0x10   :  { %353 = vmatprep.subr.bf16.mxu0 %v371_v10 }
  0x13   :  { %355 = vmatpush3.bf16.msra.mxu0 %v354_v19 }
  0x81   :  { %v55_v26 = vpop.permute.xlu1 %54  ;;  %v45_v27 = vpop.permute.xlu0 %44 }
  0x82   :  { %v62_v30 = vmul.f32 %v45_v27, %v30_v24  ;;  %v66_v31 = vmul.f32 %v45_v27, %v34_v25  ;;  %v64_v38 = vmul.f32 %v55_v26, %v32_v28  ;;  %v68_v39 = vmul.f32 %v55_v26, %v36_v29 }
  0x84   :  { %v71_v42 = vsel %vm70_vm1, %v62_v30, 0.0  ;;  %v84_v43 = vsel %vm70_vm1, %v66_v31, 0.0  ;;  %v74_v50 = vsel %vm70_vm1, %v64_v38, 0.0  ;;  %v87_v51 = vsel %vm70_vm1, %v68_v39, 0.0 }
  0x85   :  { %v60_v34 = vpop.permute.xlu1 %59  ;;  %v50_v37 = vpop.permute.xlu0 %49 }
  0x86   :  { %v63_v40 = vmul.f32 %v50_v37, %v31_v32  ;;  %v67_v41 = vmul.f32 %v50_v37, %v35_v33  ;;  %v65_v44 = vmul.f32 %v60_v34, %v33_v35  ;;  %v69_v45 = vmul.f32 %v60_v34, %v37_v36 }
  0x88   :  { %v72_v46 = vsel %vm70_vm1, %v63_v40, 0.0  ;;  %v85_v47 = vsel %vm70_vm1, %v67_v41, 0.0  ;;  %v76_v54 = vsel %vm70_vm1, %v65_v44, 0.0  ;;  %v89_v55 = vsel %vm70_vm1, %v69_v45, 0.0 }
  0x89   :  { %v73_v48 = vadd.f32 %v72_v46, %v71_v42  ;;  %v86_v49 = vadd.f32 %v85_v47, %v84_v43  ;;  %v105_v6 = vpop.permute.xlu0 %104 }
  0x8b   :  { %v75_v52 = vadd.f32 %v74_v50, %v73_v48  ;;  %v88_v53 = vadd.f32 %v87_v51, %v86_v49 }
  0x8d   :  { %v77_v56 = vadd.f32 %v76_v54, %v75_v52  ;;  %v90_v57 = vadd.f32 %v89_v55, %v88_v53 }
  0x8f   :  { %v78_v58 = vrot.slane %v77_v56, 4  ;;  %v91_v59 = vrot.slane %v90_v57, 4 }
  0x91   :  { %v79_v60 = vadd.f32 %v78_v58, %v77_v56  ;;  %v92_v61 = vadd.f32 %v91_v59, %v90_v57 }
  0x93   :  { %v80_v62 = vrot.slane %v79_v60, 2  ;;  %v93_v63 = vrot.slane %v92_v61, 2 }
  0x95   :  { %v81_v0 = vadd.f32 %v80_v62, %v79_v60  ;;  %v94_v1 = vadd.f32 %v93_v63, %v92_v61 }
  0x97   :  { %v82_v2 = vrot.slane %v81_v0, 1  ;;  %v95_v3 = vrot.slane %v94_v1, 1 }
  0x99   :  { %v83_v4 = vadd.f32 %v82_v2, %v81_v0  ;;  %v96_v5 = vadd.f32 %v95_v3, %v94_v1 }
  0x9b   :  { %v107_v7 = vadd.f32 %v105_v6, %v83_v4  ;;  %v108_v8 = vadd.f32 %v105_v6, %v96_v5 }
  0x9d   :  { %v109_v9 = vmax.f32 %v107_v7, 0.0  ;;  %v110_v10 = vmax.f32 %v108_v8, 0.0 }
  0x9f   :  { %v129_v11 = vsel %vm128_vm2, %v110_v10, %v109_v9 }
  0xa0   :  { %331 = vmatmul.mubr.msk.f32.vlgmr.msra.gmra.mrb[0].mxu0 %vm70_vm1, %v129_v11 }
 0x173   :  { %v198_v17 = vpop.f32.mrb[0].mxu0 }
 0x174   :  { %v199_v18 = vadd.f32 %v296_v16, %v198_v17  ;;  %v332_v19 = vpop.f32.mrb[1].mxu0 }
 0x176   :  { %v202_v20 = vmax.f32 %v199_v18, 0.0 }
 0x178   :  { %342 = vmatmul.mubr.msk.f32.vlgmr.msra.gmra.mrb[0].mxu1 %vm214_vm3, %v202_v20 }
 0x24b   :  { %v284_v22 = vpop.f32.mrb[0].mxu1 }
 0x24c   :  { %v285_v23 = vadd.f32 %v298_v21, %v284_v22  ;;  %v343_v24 = vpop.f32.mrb[1].mxu1 }
 0x24e   :  { %368 = vtanh.f32 %v285_v23 }
 0x258   :  { %v369_v25 = vpop.eup %368 }
 0x259   :  { %290 = vst.msk [vmem:[%s514_s7] sm:$0x3] %vm289_vm4, %v369_v25 }

</bundles_post_ra>
